<compile_context>
chip_gen: v6e
topology: v6e:2x2x1
jax: 0.10.0
libtpu: 0.0.40
codegen_flags: <defaults>
</compile_context>

<pallas_src>
import functools

import jax
import jax.numpy as jnp
from jax import lax
from jax.experimental import pallas as pl
from jax.experimental.pallas import tpu as pltpu


_VMEM_BUDGET = 20 * 1024 * 1024        # modeled per-step VMEM target (all gens)
_VMEM_LIMIT = 32 * 1024 * 1024         # scoped VMEM limit handed to Mosaic
_STEP_BYTES_TARGET = 2 * 1024 * 1024   # per-grid-step HBM traffic target
_MAX_TL = 32 * 1024                    # absolute cap on the L tile
_CHUNK_ROWS = 2048                     # in-kernel matmul chunk (bounds f32 temps)
_SUBLANE_MIN = {4: 8, 2: 16, 1: 32}    # min second-minor tile per dtype itemsize


def _round_up(v, m):
    return -(-v // m) * m


# ---------------------------------------------------------------------------
# Lane-dense ("packed") path for small outDims (N | 128, N <= 16).
# ---------------------------------------------------------------------------

def _wxpb_packed_kernel(x_ref, w_ref, bpk_ref, o_ref, *, nn, tb, tl, chunk):
    """x_ref: (TB, K, TL); w_ref: (K, N); bpk_ref: (1, 128) G-tiled bias;
    o_ref: (TB, TL*N//128, 128) lane-dense packed output."""
    g = 128 // nn
    bias = bpk_ref[...].astype(jnp.float32)            # (1, 128), hoisted
    for bb in range(tb):                                # static unroll (tb <= 16)
        for c0 in range(0, tl, chunk):                  # static unroll
            ch = min(chunk, tl - c0)                    # multiple of g by construction
            xc = x_ref[bb, :, pl.ds(c0, ch)]            # (K, ch), channels on sublanes
            # Channel contraction on the MXU.  Transposed-LHS form keeps the
            # activation in its native (K, L) layout; K <= 8 makes any implied
            # relayout negligible next to the HBM traffic.
            acc = lax.dot_general(
                xc, w_ref[...],
                dimension_numbers=(((0,), (0,)), ((), ())),
                preferred_element_type=jnp.float32)      # (ch, N)
            # Pack G consecutive rows into each 128-lane output row:
            #   packed[r, j*N + o] = acc[r*G + j, o]
            # leading-dim split (layout no-op) + sublane selects + lane concat
            # -> XLU work, which has slack in this memory-bound kernel.
            acc3 = acc.reshape(ch // g, g, nn)
            packed = jnp.concatenate(
                [acc3[:, j, :] for j in range(g)], axis=-1)   # (ch//g, 128)
            packed = packed + bias
            r0 = c0 // g
            o_ref[bb, pl.ds(r0, ch // g), :] = packed.astype(o_ref.dtype)


def _packed_tiles(B, K, L, N, itemsize):
    """Tile sizes for the lane-dense path, using padded-dim VMEM accounting."""
    g = 128 // N
    k_pad = _round_up(K, _SUBLANE_MIN.get(itemsize, 8))
    align = max(128, 8 * g)                    # legal x-lane / out-sublane tiling
    fixed = 3 * _CHUNK_ROWS * 128 * 4          # f32 acc (lane-padded) + packed + slack
    per_l = 2 * (k_pad + N) * itemsize         # double-buffered input + dense output
    cap = max(align, min((_VMEM_BUDGET - fixed) // per_l, _MAX_TL))
    if L <= cap:
        tl = L                                  # full-extent block (always legal)
    else:
        tl = max(align, (cap // align) * align)
    # Batch tile for large-B / short-L workloads (otherwise each grid step
    # moves only a few KB against ~0.35 us of fixed per-step overhead).
    tb = 1
    if tl == L and B > 1:
        step_bytes = tl * (K + N) * itemsize
        if step_bytes < _STEP_BYTES_TARGET:
            tb = min(B, max(1, _STEP_BYTES_TARGET // max(step_bytes, 1)))
            tb = min(tb, max(1, (_VMEM_BUDGET - fixed) // (tl * per_l)))
            tb = min(tb, 16)                    # keep the static in-kernel unroll small
    # v7x megacore: keep at least two grid blocks when there is enough work.
    if (-(-B // tb)) * (-(-L // tl)) < 2:
        if B >= 2:
            tb = (B + 1) // 2
        elif L >= 2 * align:
            tl = _round_up(-(-L // 2), align)
    chunk = min(_CHUNK_ROWS, tl)
    return tb, tl, chunk


def _forward_packed(x3, w_kn, bias, out_dtype):
    B, K, L = x3.shape
    N = w_kn.shape[1]
    itemsize = x3.dtype.itemsize
    g = 128 // N
    tb, tl, chunk = _packed_tiles(B, K, L, N, itemsize)
    rows_total = (L * N) // 128
    rows_tl = (tl * N) // 128
    grid = (pl.cdiv(B, tb), pl.cdiv(L, tl))

    bias_packed = jnp.tile(bias.astype(jnp.float32), g).reshape(1, 128)

    kernel = functools.partial(_wxpb_packed_kernel, nn=N, tb=tb, tl=tl, chunk=chunk)

    cost = pl.CostEstimate(
        flops=2 * B * L * K * N,
        transcendentals=0,
        bytes_accessed=itemsize * (B * K * L + B * L * N)
        + w_kn.dtype.itemsize * K * N + 4 * 128,
    )

    out3 = pl.pallas_call(
        kernel,
        out_shape=jax.ShapeDtypeStruct((B, rows_total, 128), out_dtype),
        grid_spec=pltpu.PrefetchScalarGridSpec(
            num_scalar_prefetch=0,
            grid=grid,
            in_specs=[
                # Activation: native (B, K, L) layout, L on lanes.
                pl.BlockSpec((tb, K, tl), lambda bi, li: (bi, 0, li)),
                # Weight / tiled bias: constant block index -> VMEM resident.
                pl.BlockSpec((K, N), lambda bi, li: (0, 0)),
                pl.BlockSpec((1, 128), lambda bi, li: (0, 0)),
            ],
            out_specs=pl.BlockSpec((tb, rows_tl, 128), lambda bi, li: (bi, li, 0)),
        ),
        compiler_params=pltpu.CompilerParams(
            dimension_semantics=("parallel", "parallel"),
            vmem_limit_bytes=_VMEM_LIMIT,
        ),
        cost_estimate=cost,
    )(x3, w_kn, bias_packed)

    # Contiguous reshape back to (B, L, N): pure metadata, no extra HBM pass.
    return out3.reshape(B, L, N)


# ---------------------------------------------------------------------------
# Plain path (outDims >= 128, or shapes that do not pack) + safety fallback.
# ---------------------------------------------------------------------------

def _wxpb_plain_kernel(x_ref, w_ref, b_ref, o_ref):
    # x_ref: (K, TL) channels on sublanes; w_ref: (K, N); b_ref: (1, N); o_ref: (TL, N)
    acc = lax.dot_general(
        x_ref[...], w_ref[...],
        dimension_numbers=(((0,), (0,)), ((), ())),
        preferred_element_type=jnp.float32)
    o_ref[...] = (acc + b_ref[...].astype(jnp.float32)).astype(o_ref.dtype)


def _plain_l_tile(K, L, N, itemsize):
    k_pad = _round_up(K, _SUBLANE_MIN.get(itemsize, 8))
    n_pad = _round_up(N, 128)                  # output VMEM tile is lane-padded
    # Per sequence position: double-buffered input + output tiles plus the f32
    # matmul / bias-add temporaries (also lane-padded).
    per_l = 2 * k_pad * itemsize + 2 * n_pad * itemsize + 2 * n_pad * 4
    tl = max(128, min(_MAX_TL, _VMEM_BUDGET // per_l) // 128 * 128)
    return L if L <= tl else tl


def _forward_plain(x3, w_kn, bias, out_dtype):
    B, K, L = x3.shape
    N = w_kn.shape[1]
    itemsize = x3.dtype.itemsize
    tl = _plain_l_tile(K, L, N, itemsize)
    grid = (B, pl.cdiv(L, tl))
    b2 = bias.reshape(1, N)
    cost = pl.CostEstimate(
        flops=2 * B * L * K * N,
        transcendentals=0,
        bytes_accessed=itemsize * (B * K * L + B * L * N)
        + w_kn.dtype.itemsize * K * N + bias.dtype.itemsize * N,
    )
    return pl.pallas_call(
        _wxpb_plain_kernel,
        out_shape=jax.ShapeDtypeStruct((B, L, N), out_dtype),
        grid_spec=pltpu.PrefetchScalarGridSpec(
            num_scalar_prefetch=0,
            grid=grid,
            in_specs=[
                pl.BlockSpec((None, K, tl), lambda b, l: (b, 0, l)),
                pl.BlockSpec((K, N), lambda b, l: (0, 0)),
                pl.BlockSpec((1, N), lambda b, l: (0, 0)),
            ],
            out_specs=pl.BlockSpec((None, tl, N), lambda b, l: (b, l, 0)),
        ),
        compiler_params=pltpu.CompilerParams(
            dimension_semantics=("parallel", "parallel"),
            vmem_limit_bytes=_VMEM_LIMIT,
        ),
        cost_estimate=cost,
    )(x3, w_kn, b2)


def wxpb_forward(x, weight, bias):
    """Forward pass of WXpB: Conv1d(kernel_size=1) followed by permute(0, 2, 1).

    Args:
      x:      (B, inDims, L, 1)
      weight: (outDims, inDims, 1)
      bias:   (outDims,)

    Returns:
      (B, L, outDims)
    """
    B, K, L, _ = x.shape
    N = weight.shape[0]

    x3 = jnp.squeeze(x, axis=-1)               # (B, K, L) -- free (size-1 dim)
    w_kn = jnp.transpose(weight[:, :, 0])      # (K, N)    -- tiny, done once in XLA

    packable = (N < 128 and 128 % N == 0 and 128 // N >= 8 and (L * N) % 128 == 0)
    if packable:
        try:
            return _forward_packed(x3, w_kn, bias, x.dtype)
        except Exception:   # pragma: no cover
            # Safety net (eager compile happens inside the try): if a Mosaic
            # toolchain rejects the in-kernel pack, fall back to the
            # previously-validated masked-store path.
            pass
    return _forward_plain(x3, w_kn, bias, x.dtype)


if __name__ == "__main__":
    key = jax.random.PRNGKey(0)
    k_x, k_w, k_b = jax.random.split(key, 3)

    B, in_dims, out_dims, L = 2, 4, 8, 16

    x = jax.random.normal(k_x, (B, in_dims, L, 1), dtype=jnp.float32)
    weight = jax.random.normal(k_w, (out_dims, in_dims, 1), dtype=jnp.float32) * 0.1
    bias = jax.random.normal(k_b, (out_dims,), dtype=jnp.float32) * 0.1

    out = wxpb_forward(x, weight, bias)
    out = jax.block_until_ready(out)

    # Reference (same math as PyTorch Conv1d k=1 + permute).
    ref = jnp.einsum("bkl,ok->blo", jnp.squeeze(x, -1), weight[:, :, 0]) + bias
    assert out.shape == (B, L, out_dims)
    assert jnp.allclose(out, ref, atol=1e-5), "mismatch vs reference"

    print("KERNEL_OK")
</pallas_src>

<mosaic_0001>
module attributes {stable_mosaic.version = 11 : i64} {
  func.func @_wxpb_packed_kernel(%arg0: i32, %arg1: i32, %arg2: memref<1x4x16xf32, #tpu.memory_space<vmem>>, %arg3: memref<4x8xf32, #tpu.memory_space<vmem>>, %arg4: memref<1x128xf32, #tpu.memory_space<vmem>>, %arg5: memref<1x1x128xf32, #tpu.memory_space<vmem>>) attributes {dimension_semantics = [#tpu.dimension_semantics<parallel>, #tpu.dimension_semantics<parallel>], iteration_bounds = array<i64: 2, 1>, scalar_prefetch = 0 : i64, scratch_operands = 0 : i64, tpu.core_type = #tpu.core_type<tc>, window_params = [{transform_indices = @transform_0, window_bounds = array<i64: 1, 4, 16>}, {pipeline_mode = #tpu.pipeline_mode<synchronous>, transform_indices = @transform_1, window_bounds = array<i64: 4, 8>}, {pipeline_mode = #tpu.pipeline_mode<synchronous>, transform_indices = @transform_2, window_bounds = array<i64: 1, 128>}, {transform_indices = @transform_3, window_bounds = array<i64: 1, 1, 128>}]} {
    %c0 = arith.constant 0 : index
    %c0_0 = arith.constant 0 : index
    %0 = vector.load %arg4[%c0, %c0_0] : memref<1x128xf32, #tpu.memory_space<vmem>>, vector<1x128xf32>
    %c0_1 = arith.constant 0 : index
    %c0_2 = arith.constant 0 : index
    %c0_3 = arith.constant 0 : index
    %1 = vector.load %arg2[%c0_1, %c0_2, %c0_3] : memref<1x4x16xf32, #tpu.memory_space<vmem>>, vector<1x4x16xf32>
    %2 = vector.shape_cast %1 : vector<1x4x16xf32> to vector<4x16xf32>
    %c0_4 = arith.constant 0 : index
    %c0_5 = arith.constant 0 : index
    %3 = vector.load %arg3[%c0_4, %c0_5] : memref<4x8xf32, #tpu.memory_space<vmem>>, vector<4x8xf32>
    %cst = arith.constant dense<0.000000e+00> : vector<16x8xf32>
    %4 = tpu.matmul %2, %3, %cst {dimension_numbers = #tpu.dot_dimension_numbers<[0], [0], [1], [1], [0, 1, 1, 1], [], []>} : vector<4x16xf32>, vector<4x8xf32>, vector<16x8xf32> -> vector<16x8xf32>
    %5 = vector.shape_cast %4 : vector<16x8xf32> to vector<1x16x8xf32>
    %6 = vector.extract_strided_slice %5 {offsets = [0, 0, 0], sizes = [1, 1, 8], strides = [1, 1, 1]} : vector<1x16x8xf32> to vector<1x1x8xf32>
    %7 = vector.shape_cast %6 : vector<1x1x8xf32> to vector<1x8xf32>
    %8 = vector.extract_strided_slice %5 {offsets = [0, 1, 0], sizes = [1, 1, 8], strides = [1, 1, 1]} : vector<1x16x8xf32> to vector<1x1x8xf32>
    %9 = vector.shape_cast %8 : vector<1x1x8xf32> to vector<1x8xf32>
    %10 = vector.extract_strided_slice %5 {offsets = [0, 2, 0], sizes = [1, 1, 8], strides = [1, 1, 1]} : vector<1x16x8xf32> to vector<1x1x8xf32>
    %11 = vector.shape_cast %10 : vector<1x1x8xf32> to vector<1x8xf32>
    %12 = vector.extract_strided_slice %5 {offsets = [0, 3, 0], sizes = [1, 1, 8], strides = [1, 1, 1]} : vector<1x16x8xf32> to vector<1x1x8xf32>
    %13 = vector.shape_cast %12 : vector<1x1x8xf32> to vector<1x8xf32>
    %14 = vector.extract_strided_slice %5 {offsets = [0, 4, 0], sizes = [1, 1, 8], strides = [1, 1, 1]} : vector<1x16x8xf32> to vector<1x1x8xf32>
    %15 = vector.shape_cast %14 : vector<1x1x8xf32> to vector<1x8xf32>
    %16 = vector.extract_strided_slice %5 {offsets = [0, 5, 0], sizes = [1, 1, 8], strides = [1, 1, 1]} : vector<1x16x8xf32> to vector<1x1x8xf32>
    %17 = vector.shape_cast %16 : vector<1x1x8xf32> to vector<1x8xf32>
    %18 = vector.extract_strided_slice %5 {offsets = [0, 6, 0], sizes = [1, 1, 8], strides = [1, 1, 1]} : vector<1x16x8xf32> to vector<1x1x8xf32>
    %19 = vector.shape_cast %18 : vector<1x1x8xf32> to vector<1x8xf32>
    %20 = vector.extract_strided_slice %5 {offsets = [0, 7, 0], sizes = [1, 1, 8], strides = [1, 1, 1]} : vector<1x16x8xf32> to vector<1x1x8xf32>
    %21 = vector.shape_cast %20 : vector<1x1x8xf32> to vector<1x8xf32>
    %22 = vector.extract_strided_slice %5 {offsets = [0, 8, 0], sizes = [1, 1, 8], strides = [1, 1, 1]} : vector<1x16x8xf32> to vector<1x1x8xf32>
    %23 = vector.shape_cast %22 : vector<1x1x8xf32> to vector<1x8xf32>
    %24 = vector.extract_strided_slice %5 {offsets = [0, 9, 0], sizes = [1, 1, 8], strides = [1, 1, 1]} : vector<1x16x8xf32> to vector<1x1x8xf32>
    %25 = vector.shape_cast %24 : vector<1x1x8xf32> to vector<1x8xf32>
    %26 = vector.extract_strided_slice %5 {offsets = [0, 10, 0], sizes = [1, 1, 8], strides = [1, 1, 1]} : vector<1x16x8xf32> to vector<1x1x8xf32>
    %27 = vector.shape_cast %26 : vector<1x1x8xf32> to vector<1x8xf32>
    %28 = vector.extract_strided_slice %5 {offsets = [0, 11, 0], sizes = [1, 1, 8], strides = [1, 1, 1]} : vector<1x16x8xf32> to vector<1x1x8xf32>
    %29 = vector.shape_cast %28 : vector<1x1x8xf32> to vector<1x8xf32>
    %30 = vector.extract_strided_slice %5 {offsets = [0, 12, 0], sizes = [1, 1, 8], strides = [1, 1, 1]} : vector<1x16x8xf32> to vector<1x1x8xf32>
    %31 = vector.shape_cast %30 : vector<1x1x8xf32> to vector<1x8xf32>
    %32 = vector.extract_strided_slice %5 {offsets = [0, 13, 0], sizes = [1, 1, 8], strides = [1, 1, 1]} : vector<1x16x8xf32> to vector<1x1x8xf32>
    %33 = vector.shape_cast %32 : vector<1x1x8xf32> to vector<1x8xf32>
    %34 = vector.extract_strided_slice %5 {offsets = [0, 14, 0], sizes = [1, 1, 8], strides = [1, 1, 1]} : vector<1x16x8xf32> to vector<1x1x8xf32>
    %35 = vector.shape_cast %34 : vector<1x1x8xf32> to vector<1x8xf32>
    %36 = vector.extract_strided_slice %5 {offsets = [0, 15, 0], sizes = [1, 1, 8], strides = [1, 1, 1]} : vector<1x16x8xf32> to vector<1x1x8xf32>
    %37 = vector.shape_cast %36 : vector<1x1x8xf32> to vector<1x8xf32>
    %38 = tpu.concatenate %7, %9, %11, %13, %15, %17, %19, %21, %23, %25, %27, %29, %31, %33, %35, %37 in 1 : vector<1x8xf32>, vector<1x8xf32>, vector<1x8xf32>, vector<1x8xf32>, vector<1x8xf32>, vector<1x8xf32>, vector<1x8xf32>, vector<1x8xf32>, vector<1x8xf32>, vector<1x8xf32>, vector<1x8xf32>, vector<1x8xf32>, vector<1x8xf32>, vector<1x8xf32>, vector<1x8xf32>, vector<1x8xf32> -> vector<1x128xf32>
    %39 = arith.addf %38, %0 : vector<1x128xf32>
    %c0_6 = arith.constant 0 : index
    %c0_7 = arith.constant 0 : index
    %c0_8 = arith.constant 0 : index
    %40 = vector.load %arg5[%c0_6, %c0_7, %c0_8] : memref<1x1x128xf32, #tpu.memory_space<vmem>>, vector<1x1x128xf32>
    %41 = vector.shape_cast %40 : vector<1x1x128xf32> to vector<1x128xf32>
    %42 = vector.shape_cast %39 : vector<1x128xf32> to vector<1x1x128xf32>
    tpu.vector_store %arg5[%c0_6, %c0_7, %c0_8], %42 {strides = array<i32>} : memref<1x1x128xf32, #tpu.memory_space<vmem>>, vector<1x1x128xf32>,
    return
  }
  func.func @transform_0(%arg0: i32, %arg1: i32) -> (i32, i32, i32) {
    %c0_i32 = arith.constant 0 : i32
    %c0_i32_0 = arith.constant 0 : i32
    return %arg0, %c0_i32, %arg1 : i32, i32, i32
  }
  func.func @transform_1(%arg0: i32, %arg1: i32) -> (i32, i32) {
    %c0_i32 = arith.constant 0 : i32
    %c0_i32_0 = arith.constant 0 : i32
    %c0_i32_1 = arith.constant 0 : i32
    return %c0_i32, %c0_i32_0 : i32, i32
  }
  func.func @transform_2(%arg0: i32, %arg1: i32) -> (i32, i32) {
    %c0_i32 = arith.constant 0 : i32
    %c0_i32_0 = arith.constant 0 : i32
    %c0_i32_1 = arith.constant 0 : i32
    return %c0_i32, %c0_i32_0 : i32, i32
  }
  func.func @transform_3(%arg0: i32, %arg1: i32) -> (i32, i32, i32) {
    %c0_i32 = arith.constant 0 : i32
    %c0_i32_0 = arith.constant 0 : i32
    return %arg0, %arg1, %c0_i32 : i32, i32, i32
  }
}

module attributes {stable_mosaic.version = 11 : i64} {
  func.func @_wxpb_plain_kernel(%arg0: i32, %arg1: i32, %arg2: memref<1x4x16xf32, #tpu.memory_space<vmem>>, %arg3: memref<4x8xf32, #tpu.memory_space<vmem>>, %arg4: memref<1x8xf32, #tpu.memory_space<vmem>>, %arg5: memref<1x16x8xf32, #tpu.memory_space<vmem>>) attributes {dimension_semantics = [#tpu.dimension_semantics<parallel>, #tpu.dimension_semantics<parallel>], iteration_bounds = array<i64: 2, 1>, scalar_prefetch = 0 : i64, scratch_operands = 0 : i64, tpu.core_type = #tpu.core_type<tc>, window_params = [{transform_indices = @transform_0, window_bounds = array<i64: 1, 4, 16>}, {pipeline_mode = #tpu.pipeline_mode<synchronous>, transform_indices = @transform_1, window_bounds = array<i64: 4, 8>}, {pipeline_mode = #tpu.pipeline_mode<synchronous>, transform_indices = @transform_2, window_bounds = array<i64: 1, 8>}, {transform_indices = @transform_3, window_bounds = array<i64: 1, 16, 8>}]} {
    %c0 = arith.constant 0 : index
    %c0_0 = arith.constant 0 : index
    %c0_1 = arith.constant 0 : index
    %0 = vector.load %arg2[%c0, %c0_0, %c0_1] : memref<1x4x16xf32, #tpu.memory_space<vmem>>, vector<1x4x16xf32>
    %1 = vector.shape_cast %0 : vector<1x4x16xf32> to vector<4x16xf32>
    %c0_2 = arith.constant 0 : index
    %c0_3 = arith.constant 0 : index
    %2 = vector.load %arg3[%c0_2, %c0_3] : memref<4x8xf32, #tpu.memory_space<vmem>>, vector<4x8xf32>
    %cst = arith.constant dense<0.000000e+00> : vector<16x8xf32>
    %3 = tpu.matmul %1, %2, %cst {dimension_numbers = #tpu.dot_dimension_numbers<[0], [0], [1], [1], [0, 1, 1, 1], [], []>} : vector<4x16xf32>, vector<4x8xf32>, vector<16x8xf32> -> vector<16x8xf32>
    %c0_4 = arith.constant 0 : index
    %c0_5 = arith.constant 0 : index
    %4 = vector.load %arg4[%c0_4, %c0_5] : memref<1x8xf32, #tpu.memory_space<vmem>>, vector<1x8xf32>
    %5 = vector.broadcast %4 : vector<1x8xf32> to vector<16x8xf32>
    %6 = arith.addf %3, %5 : vector<16x8xf32>
    %c0_6 = arith.constant 0 : index
    %c0_7 = arith.constant 0 : index
    %c0_8 = arith.constant 0 : index
    %7 = vector.load %arg5[%c0_6, %c0_7, %c0_8] : memref<1x16x8xf32, #tpu.memory_space<vmem>>, vector<1x16x8xf32>
    %8 = vector.shape_cast %7 : vector<1x16x8xf32> to vector<16x8xf32>
    %9 = vector.shape_cast %6 : vector<16x8xf32> to vector<1x16x8xf32>
    tpu.vector_store %arg5[%c0_6, %c0_7, %c0_8], %9 {strides = array<i32>} : memref<1x16x8xf32, #tpu.memory_space<vmem>>, vector<1x16x8xf32>,
    return
  }
  func.func @transform_0(%arg0: i32, %arg1: i32) -> (i32, i32, i32) {
    %c0_i32 = arith.constant 0 : i32
    %c0_i32_0 = arith.constant 0 : i32
    return %arg0, %c0_i32, %arg1 : i32, i32, i32
  }
  func.func @transform_1(%arg0: i32, %arg1: i32) -> (i32, i32) {
    %c0_i32 = arith.constant 0 : i32
    %c0_i32_0 = arith.constant 0 : i32
    %c0_i32_1 = arith.constant 0 : i32
    return %c0_i32, %c0_i32_0 : i32, i32
  }
  func.func @transform_2(%arg0: i32, %arg1: i32) -> (i32, i32) {
    %c0_i32 = arith.constant 0 : i32
    %c0_i32_0 = arith.constant 0 : i32
    %c0_i32_1 = arith.constant 0 : i32
    return %c0_i32, %c0_i32_0 : i32, i32
  }
  func.func @transform_3(%arg0: i32, %arg1: i32) -> (i32, i32, i32) {
    %c0_i32 = arith.constant 0 : i32
    %c0_i32_0 = arith.constant 0 : i32
    return %arg0, %arg1, %c0_i32 : i32, i32, i32
  }
}

</mosaic_0001>

<bundles_post_ra>
// kernel: tpu_custom_call.1
= control target key start
LH: loop header
LB: loop body
LE: loop exit
PB: predicated region body
PF: predicated region fallthrough
CT: control target
= control target key end

     0   :  { %8 = vsyncpa [#allocation3], 0  ;;  %s985_s0 = inlined_call_operand.hbm [shape: f32[2,4,16], index: 0, kind: input, shape index: {}]   ;;  %s986_s1 = inlined_call_operand.hbm [shape: f32[4,8], index: 1, kind: input, shape index: {}]   ;;  %s987_s2 = inlined_call_operand.vmem [shape: f32[1,128], index: 2, kind: input, shape index: {}]   ;;  %s988_s3 = inlined_call_operand.hbm [shape: f32[2,1,128], index: 3, kind: output, shape index: {}]  }
   0x1   :  { %10 = vsyncpa [#allocation3 + $0x1], 0 }
   0x2   :  { %11 = vsyncpa [#allocation6], 0 }
   0x3   :  { %12 = vsyncpa [#allocation4], 0 }
   0x4   :  { %14 = vsyncpa [#allocation4 + $0x1], 0  ;;  %s820_s12 = smov 0   ;;  %s822_s13 = smov 0  }
   0x5   :  { %s824_s14 = smov 0   ;;  %s826_s15 = smov 0  }
   0x6   :  { %s828_s16 = smov 0   ;;  %s830_s17 = smov 0  }
   0x7 LB: > { %s529_s18 = sadd.s32 4294967295, %s780_s17   ;;  %s530_s19 = sadd.s32 4294967294, %s780_s17   ;;  %s780_s17 = sphi %s830_s17, %s20_s17   ;;  %s776_s16 = sphi %s828_s16, %s1005_s16   ;;  %s772_s15 = sphi %s826_s15, %s1004_s15   ;;  %s768_s14 = sphi %s824_s14, %s1003_s14   ;;  %s764_s13 = sphi %s822_s13, %s1002_s13   ;;  %s760_s12 = sphi %s820_s12, %s1001_s12  }
   0x8   : > { %p54_p0 = scmp.ne.s32.totalorder %s764_s13, %s760_s12  ;;  %p854_p1 = scmp.eq.s32.totalorder %s529_s18, 0 }
   0x9   : > { %p858_p2 = scmp.eq.s32.totalorder %s529_s18, 1  ;;  %p128_p3 = scmp.eq.s32.totalorder %s530_s19, 1 }
   0xa   : > { %p864_p4 = por %p854_p1, %p54_p0  ;;  %p531_p5 = scmp.ge.s32.totalorder %s780_s17, 1 }
   0xb   : > { %p869_p6 = por %p128_p3, %p54_p0  ;;  %p135_p7 = scmp.lt.s32.totalorder %s780_s17, 3 }
   0xc   : > { %s992_s22 = scalar_select %p864_p4, 1, 0 }
   0xd   : > { %s993_s23 = scalar_select %p869_p6, 1, 0 }
   0xe   : > { %p874_p8 = pnand %p531_p5, %p135_p7  ;;  %s782_s25 = smov [#allocation5]  }
   0xf   : > { %s148_s26 = sshll.u32 %s782_s25, 4  ;;  %s32_s28 = sadd.s32 1, %s776_s16  ;;  %s149_s26 = int_to_ptr.vmem [resolvable:$true] %s148_s26 }
  0x10   : > { %p561_p10 = pneg %p874_p8  ;;  %s41_s29 = sadd.s32 1, %s768_s14 }
  0x11   : > { %p34_p12 = scmp.ge.s32.totalorder %s32_s28, 2  ;;  %s653_s30 = scalar_lea.vmem %s149_s26, 64 }
  0x12   : > { %p883_p11 = pnand %p561_p10, %p854_p1  ;;  %p654_p0 = scmp.ne.s32.totalorder %s149_s26, %s653_s30 }
  0x13   : > { %p661_p7 = scmp.lt.s32.totalorder %s149_s26, %s149_s26  ;;  %p662_p6 = scmp.lt.s32.totalorder %s653_s30, %s653_s30 }
  0x14   : > { %p644_p13 = pneg %p883_p11 }
  0x15   : > { %p663_p9 = por %p662_p6, %p661_p7 }
  0x16   : > { %p656_p3 = pnand %p654_p0, %p644_p13 }
  0x18   : > { %p657_p5 = pneg %p656_p3 }
  0x1a   : > { %p664_p4 = pnand %p663_p9, %p657_p5 }
  0x1c   : > { %667 = shalt.err (!%p664_p4)
}
  0x1d   : > { %564 = dma.hbm_to_vmem [thread:$0]  (!%p883_p11), %s986_s1, 64, %s149_s26, [#allocation6]  }
  0x1e   : > { %s1007_s28 = smov (%p34_p12, %s32_s28), 0  ;;  %p48_p6 = scmp.ne.s32.totalorder %s768_s14, %s764_s13 }
  0x1f   : > { %p49_p4 = scmp.eq.s32.totalorder %s780_s17, 0  ;;  %s36_s6 = ssub.s32 %s776_s16, %s1007_s28 }
  0x20   : > { %p574_p9 = scmp.lt.s32.totalorder %s780_s17, 2  ;;  %p39_p10 = scmp.eq.s32.totalorder %s36_s6, 0 }
  0x21   : > { %p50_p13 = por %p49_p4, %p48_p6  ;;  %p906_p0 = por %p858_p2, %p48_p6 }
  0x22   : > { %s162_s8 = sand.u32 1, %s768_s14   ;;  %s535_s11 = sshll.u32 %s776_s16, 6 }
  0x23   : > { %s912_s9 = scalar_select %p39_p10, %s768_s14, %s41_s29  }
  0x24   : > { %s534_s10 = sshll.u32 %s162_s8, 2  ;;  %s172_s25 = scalar_lea.hbm %s985_s0, %s535_s11 }
  0x25   : > { %s166_s26 = scalar_lea.vmem [#allocation2], %s534_s10  ;;  %p918_p11 = pnand %p574_p9, %p50_p13 }
  0x26   : > { %s174_s27 = sshll.u32 %s166_s26, 4  ;;  %s163_s21 = scalar_lea.sflag [#allocation3], %s162_s8  ;;  %s175_s27 = int_to_ptr.vmem [resolvable:$true] %s174_s27 }
  0x27   : > { %p670_p2 = pneg %p918_p11  ;;  %s681_s4 = scalar_lea.vmem %s175_s27, 64 }
  0x28   : > { %p682_p12 = scmp.ne.s32.totalorder %s175_s27, %s681_s4  ;;  %s783_s29 = smov [#allocation2]  }
  0x29   : > { %s686_s5 = sshll.u32 %s783_s29, 4  ;;  %s687_s5 = int_to_ptr.vmem [resolvable:$false] %s686_s5 }
  0x2a   : > { %p684_p3 = pnand %p682_p12, %p670_p2  ;;  %s688_s6 = scalar_lea.vmem %s687_s5, 128 }
  0x2b   : > { %p689_p7 = scmp.lt.s32.totalorder %s175_s27, %s687_s5  ;;  %p690_p6 = scmp.lt.s32.totalorder %s688_s6, %s681_s4 }
  0x2c   : > { %p685_p5 = pneg %p684_p3 }
  0x2d   : > { %p691_p4 = por %p690_p6, %p689_p7 }
  0x2f   : > { %p692_p10 = pnand %p691_p4, %p685_p5 }
  0x31   : > { %695 = shalt.err (!%p692_p10)
}
  0x32   : > { %568 = dma.hbm_to_vmem [thread:$0]  (!%p918_p11), %s172_s25, 64, %s175_s27, %s163_s21  }
  0x33   : > { %183 = sbr.rel (%p874_p8) target bundleno = 562 (0x232), region = 32  ;;  %s929_s8 = sand.u32 (!%p874_p8), 1, %s764_s13  }
  0x34   : > { %s537_s10 = sshll.u32 (!%p874_p8), %s929_s8, 2  ;;  %s186_s11 = scalar_lea.sflag (!%p874_p8), [#allocation3], %s929_s8 }
  0x35   : > { %s189_s18 = scalar_lea.vmem (!%p874_p8), [#allocation2], %s537_s10  ;;  %p998_p9 = scmp.ne.s32.totalorder (!%p874_p8), %s992_s22, 0 }
  0x38   : > { %747 = dma.done.wait (%p998_p9), %s186_s11, 64  }
  0x39   : > { %749 = vsyncadd (%p998_p9), %s186_s11, 4294967232 }
  0x3a   : > { %751 = dma.done.wait (%p854_p1), [#allocation6], 64  }
  0x3b   : > { %753 = vsyncadd (%p854_p1), [#allocation6], 4294967232  ;;  %vm257_vm0 = vcmask 1043456   ;;  %v216_v0 = vld [vmem:[%s189_s18] sm:$0xf]  ;;  %vm250_vm1 = vcmask 31744  }
  0x3c   : > { %v217_v1 = vld [vmem:[#allocation5] sm:$0xf]  ;;  %218 = vxpose.xlu0.b32.start.end [1/1] (short) (narrow) %v216_v0, 16  ;;  %s784_s22 = smov 64   ;;  %s785_s24 = smov 72   ;;  %vm397_vm2 = vcmask 64512  }
  0x3d   : > { %548 = vmatprep.subr.msk.mxu0 %vm257_vm0, %v217_v1  ;;  %s786_s20 = smov 8   ;;  %s787_s19 = smov 80   ;;  %vm399_vm3 = vcmask 130048   ;;  %vm401_vm4 = vcmask 195584   ;;  %vm403_vm5 = vcmask 261120   ;;  %vm405_vm6 = vcmask 326656  }
  0x3e   : > { %549 = vmatpush3.msk.msra.mxu0 %vm257_vm0, %v217_v1  ;;  %s788_s25 = smov 120   ;;  %s789_s26 = smov 88   ;;  %vm407_vm7 = vcmask 392192   ;;  %vm409_vm8 = vcmask 457728   ;;  %vm411_vm9 = vcmask 523264   ;;  %vm413_vm10 = vcmask 588800  }
  0x3f   : > { %s790_s27 = smov 96   ;;  %s791_s30 = smov 16   ;;  %vm415_vm11 = vcmask 654336   ;;  %vm417_vm12 = vcmask 719872   ;;  %vm419_vm13 = vcmask 785408   ;;  %vm421_vm14 = vcmask 850944  }
  0x40   : > { %s792_s21 = smov 24   ;;  %s793_s4 = smov 32   ;;  %vm423_vm15 = vcmask 916480   ;;  %vm425_vm0 = vcmask 982016   ;;  %v215_v47 = vld [vmem:[%s987_s2] sm:$0x1] }
  0x41   : > { %s794_s29 = smov 40   ;;  %s795_s5 = smov 48  }
  0x42   : > { %s796_s6 = smov 56   ;;  %s797_s10 = smov 104  }
  0x43   : > { %s798_s11 = smov 112  }
  0xb8   : > { %v234_v2 = vpop.trf.xlu0 }
  0xb9   : > { %550 = vmatprep.mubr.msk.f32.mxu0 %vm250_vm1, %v234_v2 }
  0xbc   : > { %v235_v3 = vpop.trf.xlu0 }
  0xbd   : > { %551 = vmatmul.mubr.msk.f32.vlgmr.msra.gmra.mxu0 %vm250_vm1, %v235_v3 }
 0x17d   : > { %v552_v4 = vpop.f32.mrf.mxu0 }
 0x17e   : > { %366 = vrot.lane.b32.xlu1 %v552_v4, %s784_s22  ;;  %v369_v6 = vrot.slane %v552_v4, 1  ;;  %v373_v8 = vrot.slane %v552_v4, 2  ;;  %v393_v9 = vrot.slane %v552_v4, 7  ;;  %v377_v10 = vrot.slane %v552_v4, 3 }
 0x17f   : > { %v327_v5 = vpop.f32.mrf.mxu0  ;;  %v381_v11 = vrot.slane %v552_v4, 4  ;;  %v385_v18 = vrot.slane %v552_v4, 5  ;;  %v389_v19 = vrot.slane %v552_v4, 6 }
 0x180   : > { %v337_v7 = vrot.slane %v327_v5, 1  ;;  %v341_v12 = vrot.slane %v327_v5, 2  ;;  %v345_v13 = vrot.slane %v327_v5, 3  ;;  %v349_v14 = vrot.slane %v327_v5, 4 }
 0x181   : > { %v353_v15 = vrot.slane %v327_v5, 5  ;;  %v357_v16 = vrot.slane %v327_v5, 6  ;;  %v361_v17 = vrot.slane %v327_v5, 7 }
 0x182   : > { %370 = vrot.lane.b32.xlu1 %v369_v6, %s785_s24  ;;  %338 = vrot.lane.b32.xlu0 %v337_v7, %s786_s20  ;;  %s542_s24 = sshll.u32 %s772_s15, 4  ;;  %s214_s20 = scalar_lea.vmem [#allocation7], %s929_s8 }
 0x186   : > { %374 = vrot.lane.b32.xlu1 %v373_v8, %s787_s19  ;;  %394 = vrot.lane.b32.xlu0 %v393_v9, %s788_s25  ;;  %s443_s19 = sshll.u32 %s214_s20, 4  ;;  %s444_s19 = int_to_ptr.vmem [resolvable:$true] %s443_s19 }
 0x18a   : > { %378 = vrot.lane.b32.xlu1 %v377_v10, %s789_s26 }
 0x18e   : > { %382 = vrot.lane.b32.xlu1 %v381_v11, %s790_s27  ;;  %s441_s27 = scalar_lea.hbm %s988_s3, %s542_s24 }
 0x192   : > { %342 = vrot.lane.b32.xlu1 %v341_v12, %s791_s30  ;;  %s430_s30 = scalar_lea.sflag [#allocation4], %s929_s8 }
 0x196   : > { %346 = vrot.lane.b32.xlu1 %v345_v13, %s792_s21  ;;  %s696_s21 = scalar_lea.vmem %s444_s19, 16 }
 0x197   : > { %p697_p1 = scmp.ne.s32.totalorder %s444_s19, %s696_s21 }
 0x199   : > { %p698_p8 = pnand %p697_p1, %p906_p0 }
 0x19a   : > { %350 = vrot.lane.b32.xlu1 %v349_v14, %s793_s4  ;;  %s799_s4 = smov [#allocation7]  }
 0x19b   : > { %p699_p13 = pneg %p698_p8  ;;  %s700_s15 = sshll.u32 %s799_s4, 4  ;;  %s701_s15 = int_to_ptr.vmem [resolvable:$false] %s700_s15 }
 0x19c   : > { %p703_p11 = scmp.lt.s32.totalorder %s444_s19, %s701_s15 }
 0x19e   : > { %354 = vrot.lane.b32.xlu1 %v353_v15, %s794_s29  ;;  %s702_s29 = scalar_lea.vmem %s701_s15, 32 }
 0x19f   : > { %p704_p2 = scmp.lt.s32.totalorder %s702_s29, %s696_s21 }
 0x1a1   : > { %p705_p12 = por %p704_p2, %p703_p11 }
 0x1a2   : > { %358 = vrot.lane.b32.xlu1 %v357_v16, %s795_s5 }
 0x1a3   : > { %p706_p3 = pnand %p705_p12, %p699_p13 }
 0x1a6   : > { %362 = vrot.lane.b32.xlu1 %v361_v17, %s796_s6 }
 0x1aa   : > { %386 = vrot.lane.b32.xlu1 %v385_v18, %s797_s10 }
 0x1ae   : > { %390 = vrot.lane.b32.xlu1 %v389_v19, %s798_s11 }
 0x1f0   : > { %v367_v20 = vpop.permute.xlu1 %366 }
 0x1f4   : > { %v371_v21 = vpop.permute.xlu1 %370  ;;  %v339_v28 = vpop.permute.xlu0 %338 }
 0x1f5   : > { %v398_v30 = vsel %vm397_vm2, %v327_v5, %v339_v28 }
 0x1f8   : > { %v375_v22 = vpop.permute.xlu1 %374  ;;  %v395_v48 = vpop.permute.xlu0 %394 }
 0x1fc   : > { %v379_v23 = vpop.permute.xlu1 %378 }
 0x200   : > { %v383_v24 = vpop.permute.xlu1 %382 }
 0x204   : > { %v343_v25 = vpop.permute.xlu1 %342 }
 0x205   : > { %v400_v31 = vsel %vm399_vm3, %v398_v30, %v343_v25 }
 0x208   : > { %v347_v26 = vpop.permute.xlu1 %346 }
 0x209   : > { %v402_v33 = vsel %vm401_vm4, %v400_v31, %v347_v26 }
 0x20c   : > { %v351_v27 = vpop.permute.xlu1 %350 }
 0x20d   : > { %v404_v34 = vsel %vm403_vm5, %v402_v33, %v351_v27 }
 0x210   : > { %v355_v29 = vpop.permute.xlu1 %354 }
 0x211   : > { %v406_v35 = vsel %vm405_vm6, %v404_v34, %v355_v29 }
 0x214   : > { %v359_v32 = vpop.permute.xlu1 %358 }
 0x215   : > { %v408_v36 = vsel %vm407_vm7, %v406_v35, %v359_v32 }
 0x218   : > { %v363_v37 = vpop.permute.xlu1 %362 }
 0x219   : > { %v410_v38 = vsel %vm409_vm8, %v408_v36, %v363_v37 }
 0x21a   : > { %v412_v39 = vsel %vm411_vm9, %v410_v38, %v367_v20 }
 0x21b   : > { %v414_v40 = vsel %vm413_vm10, %v412_v39, %v371_v21 }
 0x21c   : > { %v387_v41 = vpop.permute.xlu1 %386  ;;  %v416_v42 = vsel %vm415_vm11, %v414_v40, %v375_v22 }
 0x21d   : > { %v418_v43 = vsel %vm417_vm12, %v416_v42, %v379_v23 }
 0x21e   : > { %v420_v44 = vsel %vm419_vm13, %v418_v43, %v383_v24 }
 0x21f   : > { %v422_v45 = vsel %vm421_vm14, %v420_v44, %v387_v41 }
 0x220   : > { %v391_v46 = vpop.permute.xlu1 %390 }
 0x221   : > { %v424_v49 = vsel %vm423_vm15, %v422_v45, %v391_v46 }
 0x222   : > { %v426_v50 = vsel %vm425_vm0, %v424_v49, %v395_v48 }
 0x223   : > { %v427_v51 = vadd.f32 %v426_v50, %v215_v47 }
 0x225   : > { %428 = vst [vmem:[%s214_s20] sm:$0x1] %v427_v51 }
 0x226   : > { %709 = shalt.err (!%p706_p3)
}
 0x227   : > { %s710_s5 = scalar_lea.hbm %s441_s27, 16  ;;  %s714_s10 = scalar_lea.hbm %s988_s3, 32 }
 0x228   : > { %p711_p5 = scmp.ne.s32.totalorder %s441_s27, %s710_s5  ;;  %p715_p4 = scmp.lt.s32.totalorder %s441_s27, %s988_s3 }
 0x229   : > { %p716_p10 = scmp.lt.s32.totalorder %s714_s10, %s710_s5 }
 0x22a   : > { %p712_p7 = pnand %p711_p5, %p906_p0 }
 0x22b   : > { %p717_p9 = por %p716_p10, %p715_p4 }
 0x22c   : > { %p713_p6 = pneg %p712_p7 }
 0x22e   : > { %p718_p1 = pnand %p717_p9, %p713_p6 }
 0x230   : > { %721 = shalt.err (!%p718_p1)
}
 0x231   : > { %559 = dma.vmem_to_hbm [thread:$0]  (%p906_p0), %s444_s19, 16, %s441_s27, %s430_s30  }
 0x232 PF: > { %s455_s22 = sand.u32 1, %s760_s12   ;;  %p999_p8 = scmp.ne.s32.totalorder %s993_s23, 0 }
 0x233   : > { %p1000_p13 = scmp.ge.s32.totalorder %s780_s17, 2  ;;  %s456_s24 = scalar_lea.sflag [#allocation4], %s455_s22 }
 0x235   : > { %p570_p11 = pnand %p1000_p13, %p999_p8 }
 0x237   : > { %p571_p2 = pneg %p570_p11 }
 0x239   : > { %755 = dma.done.wait (%p571_p2), %s456_s24, 16  }
 0x23a   : > { %757 = vsyncadd (%p571_p2), %s456_s24, 4294967280  ;;  %s20_s17 = sadd.s32 1, %s780_s17   ;;  %s1001_s12 = smov %s764_s13 }
 0x23b   : > { %p17_p12 = scmp.ge.s32.totalorder %s20_s17, 4   ;;  %s1002_s13 = smov %s768_s14 }
 0x23c   : > { %s1003_s14 = smov %s912_s9  ;;  %s1004_s15 = smov %s776_s16 }
 0x23d   : > { %s1005_s16 = smov %s1007_s28  ;;  %19 = sbr.rel (!%p17_p12) target bundleno = 7 (0x7), region = 81 }
 0x242   :  { %460 = vsyncpa [#allocation3], 1 }
 0x243   :  { %462 = vsyncpa [#allocation3 + $0x1], 1 }
 0x244   :  { %463 = vsyncpa [#allocation6], 1 }
 0x245   :  { %464 = vsyncpa [#allocation4], 1 }
 0x246   :  { %466 = vsyncpa [#allocation4 + $0x1], 1 }

// kernel: tpu_custom_call.1
= control target key start
LH: loop header
LB: loop body
LE: loop exit
PB: predicated region body
PF: predicated region fallthrough
CT: control target
= control target key end

     0   :  { %8 = vsyncpa [#allocation3], 0  ;;  %s810_s0 = inlined_call_operand.hbm [shape: f32[2,4,16], index: 0, kind: input, shape index: {}]   ;;  %s811_s1 = inlined_call_operand.hbm [shape: f32[4,8], index: 1, kind: input, shape index: {}]   ;;  %s812_s2 = inlined_call_operand.vmem [shape: f32[1,8], index: 2, kind: input, shape index: {}]   ;;  %s813_s3 = inlined_call_operand.vmem [shape: f32[2,16,8], index: 3, kind: output, shape index: {}]  }
   0x1   :  { %10 = vsyncpa [#allocation3 + $0x1], 0 }
   0x2   :  { %11 = vsyncpa [#allocation5], 0  ;;  %s686_s12 = smov 0   ;;  %s688_s13 = smov 0  }
   0x3   :  { %s690_s14 = smov 0   ;;  %s692_s15 = smov 0  }
   0x4   :  { %s694_s16 = smov 0   ;;  %s696_s17 = smov 0  }
   0x5 LB: > { %s460_s18 = sadd.s32 4294967295, %s662_s17   ;;  %p51_p0 = scmp.ne.s32.totalorder %s646_s13, %s642_s12  ;;  %s662_s17 = sphi %s696_s17, %s17_s17   ;;  %s658_s16 = sphi %s694_s16, %s823_s16   ;;  %s654_s15 = sphi %s692_s15, %s822_s15   ;;  %s650_s14 = sphi %s690_s14, %s821_s14   ;;  %s646_s13 = sphi %s688_s13, %s820_s13   ;;  %s642_s12 = sphi %s686_s12, %s819_s12  }
   0x6   : > { %p716_p1 = scmp.eq.s32.totalorder %s460_s18, 0  ;;  %p462_p2 = scmp.ge.s32.totalorder %s662_s17, 1 }
   0x7   : > { %p132_p3 = scmp.lt.s32.totalorder %s662_s17, 3  ;;  %s664_s22 = smov [#allocation4]  }
   0x8   : > { %p724_p4 = por %p716_p1, %p51_p0  ;;  %s145_s23 = sshll.u32 %s664_s22, 4  ;;  %s146_s23 = int_to_ptr.vmem [resolvable:$true] %s145_s23 }
   0x9   : > { %p728_p5 = pnand %p462_p2, %p132_p3  ;;  %s29_s25 = sadd.s32 1, %s658_s16 }
   0xa   : > { %s38_s26 = sadd.s32 1, %s650_s14  ;;  %p31_p8 = scmp.ge.s32.totalorder %s29_s25, 2 }
   0xb   : > { %p493_p6 = pneg %p728_p5  ;;  %s565_s27 = scalar_lea.vmem %s146_s23, 64 }
   0xc   : > { %p566_p10 = scmp.ne.s32.totalorder %s146_s23, %s565_s27  ;;  %p573_p13 = scmp.lt.s32.totalorder %s146_s23, %s146_s23 }
   0xd   : > { %p736_p7 = pnand %p493_p6, %p716_p1  ;;  %p574_p0 = scmp.lt.s32.totalorder %s565_s27, %s565_s27 }
   0xf   : > { %p556_p9 = pneg %p736_p7  ;;  %p575_p2 = por %p574_p0, %p573_p13 }
  0x11   : > { %p568_p11 = pnand %p566_p10, %p556_p9 }
  0x13   : > { %p569_p12 = pneg %p568_p11 }
  0x15   : > { %p576_p3 = pnand %p575_p2, %p569_p12 }
  0x17   : > { %579 = shalt.err (!%p576_p3)
}
  0x18   : > { %496 = dma.hbm_to_vmem [thread:$0]  (!%p736_p7), %s811_s1, 64, %s146_s23, [#allocation5]  }
  0x19   : > { %s825_s25 = smov (%p31_p8, %s29_s25), 0  ;;  %p45_p6 = scmp.ne.s32.totalorder %s650_s14, %s646_s13 }
  0x1a   : > { %p46_p9 = scmp.eq.s32.totalorder %s662_s17, 0  ;;  %s33_s30 = ssub.s32 %s658_s16, %s825_s25 }
  0x1b   : > { %p502_p10 = scmp.lt.s32.totalorder %s662_s17, 2  ;;  %p36_p11 = scmp.eq.s32.totalorder %s33_s30, 0 }
  0x1c   : > { %p47_p12 = por %p46_p9, %p45_p6  ;;  %s159_s4 = sand.u32 1, %s650_s14  }
  0x1d   : > { %s466_s5 = sshll.u32 %s658_s16, 6  ;;  %s465_s7 = sshll.u32 %s159_s4, 2 }
  0x1e   : > { %s760_s6 = scalar_select %p36_p11, %s650_s14, %s38_s26  }
  0x1f   : > { %s169_s10 = scalar_lea.hbm %s810_s0, %s466_s5  ;;  %s163_s11 = scalar_lea.vmem [#allocation2], %s465_s7 }
  0x20   : > { %s171_s12 = sshll.u32 %s163_s11, 4  ;;  %p765_p7 = pnand %p502_p10, %p47_p12  ;;  %s172_s12 = int_to_ptr.vmem [resolvable:$true] %s171_s12 }
  0x21   : > { %s160_s22 = scalar_lea.sflag [#allocation3], %s159_s4  ;;  %s593_s23 = scalar_lea.vmem %s172_s12, 64 }
  0x22   : > { %p582_p8 = pneg %p765_p7  ;;  %p594_p13 = scmp.ne.s32.totalorder %s172_s12, %s593_s23 }
  0x23   : > { %s665_s24 = smov [#allocation2]  }
  0x24   : > { %p596_p0 = pnand %p594_p13, %p582_p8  ;;  %s598_s26 = sshll.u32 %s665_s24, 4  ;;  %s599_s26 = int_to_ptr.vmem [resolvable:$false] %s598_s26 }
  0x25   : > { %s600_s27 = scalar_lea.vmem %s599_s26, 128  ;;  %p601_p3 = scmp.lt.s32.totalorder %s172_s12, %s599_s26 }
  0x26   : > { %p597_p2 = pneg %p596_p0  ;;  %p602_p6 = scmp.lt.s32.totalorder %s600_s27, %s593_s23 }
  0x28   : > { %p603_p9 = por %p602_p6, %p601_p3 }
  0x2a   : > { %p604_p10 = pnand %p603_p9, %p597_p2 }
  0x2c   : > { %607 = shalt.err (!%p604_p10)
}
  0x2d   : > { %500 = dma.hbm_to_vmem [thread:$0]  (!%p765_p7), %s169_s10, 64, %s172_s12, %s160_s22  }
  0x2e   : > { %180 = sbr.rel (%p728_p5) target bundleno = 382 (0x17e), region = 32  ;;  %s182_s28 = sand.u32 (!%p728_p5), 1, %s646_s13  }
  0x2f   : > { %s468_s29 = sshll.u32 (!%p728_p5), %s182_s28, 2  ;;  %s183_s30 = scalar_lea.sflag (!%p728_p5), [#allocation3], %s182_s28 }
  0x30   : > { %s186_s4 = scalar_lea.vmem (!%p728_p5), [#allocation2], %s468_s29 }
  0x33   : > { %633 = dma.done.wait (%p724_p4), %s183_s30, 64  }
  0x34   : > { %635 = vsyncadd (%p724_p4), %s183_s30, 4294967232 }
  0x35   : > { %637 = dma.done.wait (%p716_p1), [#allocation5], 64  }
  0x36   : > { %639 = vsyncadd (%p716_p1), [#allocation5], 4294967232  ;;  %vm275_vm0 = vcmask 1043456   ;;  %v227_v0 = vld [vmem:[%s186_s4] sm:$0xf]  ;;  %vm268_vm1 = vcmask 31744  }
  0x37   : > { %v228_v1 = vld [vmem:[#allocation4] sm:$0xf]  ;;  %236 = vxpose.xlu0.b32.start.end [1/1] (short) (narrow) %v227_v0, 16  ;;  %p218_p4 = scmp.lt.s32.totalorder %s654_s15, 1  ;;  %v472_v4 = vld [vmem:[%s812_s2] ss:$0 sm:$0xff] }
  0x38   : > { %482 = vmatprep.subr.msk.mxu0 %vm275_vm0, %v228_v1  ;;  %vm354_vm2 = vcmask 64512  }
  0x39   : > { %483 = vmatpush3.msk.msra.mxu0 %vm275_vm0, %v228_v1  ;;  %s827_s15 = smov (!%p218_p4, %s654_s15), 1 }
  0x3a   : > { %s478_s20 = sshll.u32 %s827_s15, 4 }
  0x3b   : > { %s225_s8 = scalar_lea.vmem %s813_s3, %s478_s20 }
  0xb3   : > { %v252_v2 = vpop.trf.xlu0 }
  0xb4   : > { %484 = vmatprep.mubr.msk.f32.mxu0 %vm268_vm1, %v252_v2 }
  0xb7   : > { %v253_v3 = vpop.trf.xlu0 }
  0xb8   : > { %485 = vmatmul.mubr.msk.f32.vlgmr.msra.gmra.mxu0 %vm268_vm1, %v253_v3 }
 0x178   : > { %v486_v5 = vpop.f32.mrf.mxu0 }
 0x179   : > { %v351_v6 = vadd.f32 %v486_v5, %v472_v4 }
 0x17a   : > { %v345_v7 = vpop.f32.mrf.mxu0 }
 0x17b   : > { %356 = vst.msk [vmem:[%s225_s8 + $0x8] sm:$0xff] %vm354_vm2, %v351_v6  ;;  %v346_v8 = vadd.f32 %v472_v4, %v345_v7 }
 0x17d   : > { %355 = vst.msk [vmem:[%s225_s8] sm:$0xff] %vm354_vm2, %v346_v8 }
 0x17e PF: > { %s17_s17 = sadd.s32 1, %s662_s17   ;;  %s819_s12 = smov %s646_s13 }
 0x17f   : > { %p14_p1 = scmp.ge.s32.totalorder %s17_s17, 4   ;;  %s820_s13 = smov %s650_s14 }
 0x180   : > { %s821_s14 = smov %s760_s6  ;;  %s822_s15 = smov %s658_s16 }
 0x181   : > { %s823_s16 = smov %s825_s25  ;;  %16 = sbr.rel (!%p14_p1) target bundleno = 5 (0x5), region = 76 }
 0x186   :  { %387 = vsyncpa [#allocation3], 1 }
 0x187   :  { %389 = vsyncpa [#allocation3 + $0x1], 1 }
 0x188   :  { %390 = vsyncpa [#allocation5], 1 }

</bundles_post_ra>
